<compile_context>
chip_gen: v7x
topology: tpu7x:2x2x1
jax: 0.10.0
libtpu: 0.0.40
codegen_flags: <defaults>
</compile_context>

<pallas_src>
import functools

import numpy as np
import jax
import jax.numpy as jnp
from jax.experimental import pallas as pl
from jax.experimental.pallas import tpu as pltpu

_SQRT2_INV = 0.7071067811865476


def _gelu_exact(x):
    # Matches torch.nn.GELU() default (approximate='none', erf-based).
    return 0.5 * x * (1.0 + jax.lax.erf(x * _SQRT2_INV))


def _round_up(v, m):
    return (v + m - 1) // m * m


def _block1_kernel(x_ref, w1_ref, b1_ref, w2_ref, b2_ref, mask_ref, out_ref,
                   *, taps, S, Lq, Lh):
    """One image per grid step.  All maps are lane-dense (spatial on lanes).

    x_ref   : (Cin_p, Lx)          flat, zero-padded spatially, +-2S margins
    w1_ref  : (Cmid_p, ker*ker*Cin_p)   taps folded into K
    b1_ref  : (Cmid_p, 1)
    w2_ref  : (Cout_p, ker*ker*Cmid_p)
    b2_ref  : (Cout_p, 1)
    mask_ref: (1, Lh)   1.0 on interior positions of the extended hidden domain
    out_ref : (Cout_p, Lq)  result on the padded flat domain; halo / pad lanes
              and pad channels are don't-care and sliced away by the wrapper.
    """
    # ---- conv1: im2col via static lane-shifted windows, one fused-K dot ----
    p1 = jnp.concatenate([x_ref[:, S + d:S + d + Lh] for d in taps], axis=0)
    h = jnp.dot(w1_ref[...], p1, preferred_element_type=jnp.float32)
    # bias + exact GELU; the 0/1 mask zeroes the halo of the hidden map,
    # which realises conv2's 'same' zero padding without a scratch buffer.
    h = _gelu_exact(h + b1_ref[...]) * mask_ref[...]

    # ---- conv2: same trick over the hidden map -----------------------------
    p2 = jnp.concatenate([h[:, S + d:S + d + Lq] for d in taps], axis=0)
    y = jnp.dot(w2_ref[...], p2, preferred_element_type=jnp.float32)
    y = y + b2_ref[...]

    # ---- residual + final exact GELU, lane-dense unmasked store ------------
    x_res = x_ref[:out_ref.shape[0], 2 * S:2 * S + Lq]
    out_ref[...] = _gelu_exact(x_res + y).astype(out_ref.dtype)


def block1_forward(x_nchw, w1, b1, w2, b2):
    """x: (N, ch, H, W); w1: (int_ch, ch, k, k); w2: (ch, int_ch, k, k)."""
    N, Cin, H, W = x_nchw.shape
    Cmid, _, ker, _ = w1.shape
    Cout = w2.shape[0]
    assert Cin == Cout, "Block1 residual requires conv2 out-channels == in-channels"
    assert ker % 2 == 1, "padding='same' here assumes an odd kernel size"
    pad = ker // 2

    Hp, Wp = H + 2 * pad, W + 2 * pad
    Lp = Hp * Wp                    # flattened padded spatial domain (true)
    S = pad * Wp + pad              # max |flat shift| of a conv tap
    Lq = _round_up(Lp, 128)         # lane-padded output domain -> unmasked stores
    Lh = Lq + 2 * S                 # extended hidden-map domain
    Lx = Lq + 4 * S                 # input domain incl. margins for conv1 taps

    cin_p = _round_up(Cin, 8)
    cmid_p = _round_up(Cmid, 8)
    cout_p = _round_up(Cout, 8)
    assert cin_p >= cout_p
    f32 = jnp.float32

    # Input: pad channels to a sublane multiple, zero-pad spatially ('same'),
    # flatten H*W (free for contiguous NCHW) and add flat margins so every
    # conv tap is a static, in-bounds lane slice.  No transposes.
    xp = jnp.pad(x_nchw.astype(f32),
                 ((0, 0), (0, cin_p - Cin), (pad, pad), (pad, pad)))
    xw = jnp.pad(xp.reshape(N, cin_p, Lp),
                 ((0, 0), (0, 0), (2 * S, Lx - Lp - 2 * S)))

    # Weights: (O, I, kh, kw) -> (O_padded, kh*kw*I_padded): taps folded into K.
    w1r = jnp.pad(jnp.transpose(w1, (0, 2, 3, 1)).astype(f32),
                  ((0, cmid_p - Cmid), (0, 0), (0, 0), (0, cin_p - Cin)))
    w1r = w1r.reshape(cmid_p, ker * ker * cin_p)
    w2r = jnp.pad(jnp.transpose(w2, (0, 2, 3, 1)).astype(f32),
                  ((0, cout_p - Cout), (0, 0), (0, 0), (0, cmid_p - Cmid)))
    w2r = w2r.reshape(cout_p, ker * ker * cmid_p)
    b1r = jnp.pad(b1.astype(f32), (0, cmid_p - Cmid)).reshape(cmid_p, 1)
    b2r = jnp.pad(b2.astype(f32), (0, cout_p - Cout)).reshape(cout_p, 1)

    # 0/1 interior mask of the extended hidden domain (host-side constant).
    t = np.arange(Lh)
    j = t - S
    hh, ww = j // Wp, j % Wp
    interior = ((j >= 0) & (j < Lp) & (hh >= pad) & (hh < pad + H)
                & (ww >= pad) & (ww < pad + W))
    mask = jnp.asarray(interior.astype(np.float32)).reshape(1, Lh)

    # Flat shift of every (dy, dx) tap; identical for both convs.
    taps = tuple((dy - pad) * Wp + (dx - pad)
                 for dy in range(ker) for dx in range(ker))

    k1, k2 = ker * ker * cin_p, ker * ker * cmid_p
    cost = pl.CostEstimate(
        flops=2 * N * (cmid_p * k1 * Lh + cout_p * k2 * Lq),
        transcendentals=N * (cmid_p * Lh + cout_p * Lq),
        bytes_accessed=4 * (xw.size + w1r.size + w2r.size + b1r.size
                            + b2r.size + mask.size + N * cout_p * Lq))

    out_flat = pl.pallas_call(
        functools.partial(_block1_kernel, taps=taps, S=S, Lq=Lq, Lh=Lh),
        out_shape=jax.ShapeDtypeStruct((N, cout_p, Lq), f32),
        grid=(N,),
        in_specs=[
            pl.BlockSpec((None, cin_p, Lx), lambda n: (n, 0, 0)),
            pl.BlockSpec((cmid_p, k1), lambda n: (0, 0)),
            pl.BlockSpec((cmid_p, 1), lambda n: (0, 0)),
            pl.BlockSpec((cout_p, k2), lambda n: (0, 0)),
            pl.BlockSpec((cout_p, 1), lambda n: (0, 0)),
            pl.BlockSpec((1, Lh), lambda n: (0, 0)),
        ],
        out_specs=pl.BlockSpec((None, cout_p, Lq), lambda n: (n, 0, 0)),
        compiler_params=pltpu.CompilerParams(
            dimension_semantics=("parallel",),
            vmem_limit_bytes=32 * 1024 * 1024),
        cost_estimate=cost,
    )(xw, w1r, b1r, w2r, b2r, mask)

    # Undo the flat/padded layout: channel + lane slice, free reshape, crop.
    out = out_flat[:, :Cout, :Lp].reshape(N, Cout, Hp, Wp)
    return out[:, :, pad:pad + H, pad:pad + W]


def block1_reference(x, w1, b1, w2, b2):
    dn = ("NCHW", "OIHW", "NCHW")
    y = jax.lax.conv_general_dilated(x, w1, (1, 1), "SAME", dimension_numbers=dn)
    y = y + b1[None, :, None, None]
    y = jax.nn.gelu(y, approximate=False)
    y = jax.lax.conv_general_dilated(y, w2, (1, 1), "SAME", dimension_numbers=dn)
    y = y + b2[None, :, None, None]
    return jax.nn.gelu(x + y, approximate=False)


if __name__ == "__main__":
    # Small shapes consistent with Block1(ch=4, int_ch=8, ker=3).
    N, CH, INT_CH, KER, HW = 2, 4, 8, 3, 16

    key = jax.random.PRNGKey(0)
    kx, k1, k2, k3, k4 = jax.random.split(key, 5)
    x = jax.random.normal(kx, (N, CH, HW, HW), dtype=jnp.float32)
    w1 = 0.1 * jax.random.normal(k1, (INT_CH, CH, KER, KER), dtype=jnp.float32)
    b1 = 0.1 * jax.random.normal(k2, (INT_CH,), dtype=jnp.float32)
    w2 = 0.1 * jax.random.normal(k3, (CH, INT_CH, KER, KER), dtype=jnp.float32)
    b2 = 0.1 * jax.random.normal(k4, (CH,), dtype=jnp.float32)

    out = jax.block_until_ready(block1_forward(x, w1, b1, w2, b2))
    ref = jax.block_until_ready(block1_reference(x, w1, b1, w2, b2))

    assert out.shape == ref.shape == (N, CH, HW, HW)
    assert jnp.allclose(out, ref, atol=2e-4, rtol=2e-4), "mismatch vs JAX reference"

    print("KERNEL_OK")
</pallas_src>

<mosaic_0001>
module attributes {stable_mosaic.version = 11 : i64} {
  func.func @_block1_kernel(%arg0: i32, %arg1: memref<1x8x460xf32, #tpu.memory_space<vmem>>, %arg2: memref<8x72xf32, #tpu.memory_space<vmem>>, %arg3: memref<8x1xf32, #tpu.memory_space<vmem>>, %arg4: memref<8x72xf32, #tpu.memory_space<vmem>>, %arg5: memref<8x1xf32, #tpu.memory_space<vmem>>, %arg6: memref<1x422xf32, #tpu.memory_space<vmem>>, %arg7: memref<1x8x384xf32, #tpu.memory_space<vmem>>) attributes {dimension_semantics = [#tpu.dimension_semantics<parallel>], iteration_bounds = array<i64: 2>, scalar_prefetch = 0 : i64, scratch_operands = 0 : i64, tpu.core_type = #tpu.core_type<tc>, window_params = [{transform_indices = @transform_0, window_bounds = array<i64: 1, 8, 460>}, {pipeline_mode = #tpu.pipeline_mode<synchronous>, transform_indices = @transform_1, window_bounds = array<i64: 8, 72>}, {pipeline_mode = #tpu.pipeline_mode<synchronous>, transform_indices = @transform_2, window_bounds = array<i64: 8, 1>}, {pipeline_mode = #tpu.pipeline_mode<synchronous>, transform_indices = @transform_3, window_bounds = array<i64: 8, 72>}, {pipeline_mode = #tpu.pipeline_mode<synchronous>, transform_indices = @transform_4, window_bounds = array<i64: 8, 1>}, {pipeline_mode = #tpu.pipeline_mode<synchronous>, transform_indices = @transform_5, window_bounds = array<i64: 1, 422>}, {transform_indices = @transform_6, window_bounds = array<i64: 1, 8, 384>}]} {
    %c0 = arith.constant 0 : index
    %c0_0 = arith.constant 0 : index
    %c0_1 = arith.constant 0 : index
    %0 = vector.load %arg1[%c0, %c0_0, %c0_1] : memref<1x8x460xf32, #tpu.memory_space<vmem>>, vector<1x8x422xf32>
    %1 = vector.shape_cast %0 : vector<1x8x422xf32> to vector<8x422xf32>
    %c0_2 = arith.constant 0 : index
    %c0_3 = arith.constant 0 : index
    %c1 = arith.constant 1 : index
    %2 = vector.load %arg1[%c0_2, %c0_3, %c1] : memref<1x8x460xf32, #tpu.memory_space<vmem>>, vector<1x8x422xf32>
    %3 = vector.shape_cast %2 : vector<1x8x422xf32> to vector<8x422xf32>
    %c0_4 = arith.constant 0 : index
    %c0_5 = arith.constant 0 : index
    %c2 = arith.constant 2 : index
    %4 = vector.load %arg1[%c0_4, %c0_5, %c2] : memref<1x8x460xf32, #tpu.memory_space<vmem>>, vector<1x8x422xf32>
    %5 = vector.shape_cast %4 : vector<1x8x422xf32> to vector<8x422xf32>
    %c0_6 = arith.constant 0 : index
    %c0_7 = arith.constant 0 : index
    %c18 = arith.constant 18 : index
    %6 = vector.load %arg1[%c0_6, %c0_7, %c18] : memref<1x8x460xf32, #tpu.memory_space<vmem>>, vector<1x8x422xf32>
    %7 = vector.shape_cast %6 : vector<1x8x422xf32> to vector<8x422xf32>
    %c0_8 = arith.constant 0 : index
    %c0_9 = arith.constant 0 : index
    %c19 = arith.constant 19 : index
    %8 = vector.load %arg1[%c0_8, %c0_9, %c19] : memref<1x8x460xf32, #tpu.memory_space<vmem>>, vector<1x8x422xf32>
    %9 = vector.shape_cast %8 : vector<1x8x422xf32> to vector<8x422xf32>
    %c0_10 = arith.constant 0 : index
    %c0_11 = arith.constant 0 : index
    %c20 = arith.constant 20 : index
    %10 = vector.load %arg1[%c0_10, %c0_11, %c20] : memref<1x8x460xf32, #tpu.memory_space<vmem>>, vector<1x8x422xf32>
    %11 = vector.shape_cast %10 : vector<1x8x422xf32> to vector<8x422xf32>
    %c0_12 = arith.constant 0 : index
    %c0_13 = arith.constant 0 : index
    %c36 = arith.constant 36 : index
    %12 = vector.load %arg1[%c0_12, %c0_13, %c36] : memref<1x8x460xf32, #tpu.memory_space<vmem>>, vector<1x8x422xf32>
    %13 = vector.shape_cast %12 : vector<1x8x422xf32> to vector<8x422xf32>
    %c0_14 = arith.constant 0 : index
    %c0_15 = arith.constant 0 : index
    %c37 = arith.constant 37 : index
    %14 = vector.load %arg1[%c0_14, %c0_15, %c37] : memref<1x8x460xf32, #tpu.memory_space<vmem>>, vector<1x8x422xf32>
    %15 = vector.shape_cast %14 : vector<1x8x422xf32> to vector<8x422xf32>
    %c0_16 = arith.constant 0 : index
    %c0_17 = arith.constant 0 : index
    %c38 = arith.constant 38 : index
    %16 = vector.load %arg1[%c0_16, %c0_17, %c38] : memref<1x8x460xf32, #tpu.memory_space<vmem>>, vector<1x8x422xf32>
    %17 = vector.shape_cast %16 : vector<1x8x422xf32> to vector<8x422xf32>
    %18 = tpu.concatenate %1, %3, %5, %7, %9, %11, %13, %15, %17 in 0 : vector<8x422xf32>, vector<8x422xf32>, vector<8x422xf32>, vector<8x422xf32>, vector<8x422xf32>, vector<8x422xf32>, vector<8x422xf32>, vector<8x422xf32>, vector<8x422xf32> -> vector<72x422xf32>
    %c0_18 = arith.constant 0 : index
    %c0_19 = arith.constant 0 : index
    %19 = vector.load %arg2[%c0_18, %c0_19] : memref<8x72xf32, #tpu.memory_space<vmem>>, vector<8x72xf32>
    %cst = arith.constant dense<0.000000e+00> : vector<8x422xf32>
    %20 = tpu.matmul %19, %18, %cst {dimension_numbers = #tpu.dot_dimension_numbers<[1], [0], [0], [1], [0, 0, 1, 1], [], []>} : vector<8x72xf32>, vector<72x422xf32>, vector<8x422xf32> -> vector<8x422xf32>
    %c0_20 = arith.constant 0 : index
    %c0_21 = arith.constant 0 : index
    %21 = vector.load %arg3[%c0_20, %c0_21] : memref<8x1xf32, #tpu.memory_space<vmem>>, vector<8x1xf32>
    %22 = vector.broadcast %21 : vector<8x1xf32> to vector<8x422xf32>
    %23 = arith.addf %20, %22 : vector<8x422xf32>
    %cst_22 = arith.constant 5.000000e-01 : f32
    %24 = vector.broadcast %cst_22 : f32 to vector<8x422xf32>
    %25 = arith.mulf %24, %23 : vector<8x422xf32>
    %cst_23 = arith.constant 0.707106769 : f32
    %26 = vector.broadcast %cst_23 : f32 to vector<8x422xf32>
    %27 = arith.mulf %23, %26 : vector<8x422xf32>
    %28 = math.erf %27 : vector<8x422xf32>
    %cst_24 = arith.constant 1.000000e+00 : f32
    %29 = vector.broadcast %cst_24 : f32 to vector<8x422xf32>
    %30 = arith.addf %29, %28 : vector<8x422xf32>
    %31 = arith.mulf %25, %30 : vector<8x422xf32>
    %c0_25 = arith.constant 0 : index
    %c0_26 = arith.constant 0 : index
    %32 = vector.load %arg6[%c0_25, %c0_26] : memref<1x422xf32, #tpu.memory_space<vmem>>, vector<1x422xf32>
    %33 = vector.broadcast %32 : vector<1x422xf32> to vector<8x422xf32>
    %34 = arith.mulf %31, %33 : vector<8x422xf32>
    %35 = vector.extract_strided_slice %34 {offsets = [0, 0], sizes = [8, 384], strides = [1, 1]} : vector<8x422xf32> to vector<8x384xf32>
    %36 = vector.extract_strided_slice %34 {offsets = [0, 1], sizes = [8, 384], strides = [1, 1]} : vector<8x422xf32> to vector<8x384xf32>
    %37 = vector.extract_strided_slice %34 {offsets = [0, 2], sizes = [8, 384], strides = [1, 1]} : vector<8x422xf32> to vector<8x384xf32>
    %38 = vector.extract_strided_slice %34 {offsets = [0, 18], sizes = [8, 384], strides = [1, 1]} : vector<8x422xf32> to vector<8x384xf32>
    %39 = vector.extract_strided_slice %34 {offsets = [0, 19], sizes = [8, 384], strides = [1, 1]} : vector<8x422xf32> to vector<8x384xf32>
    %40 = vector.extract_strided_slice %34 {offsets = [0, 20], sizes = [8, 384], strides = [1, 1]} : vector<8x422xf32> to vector<8x384xf32>
    %41 = vector.extract_strided_slice %34 {offsets = [0, 36], sizes = [8, 384], strides = [1, 1]} : vector<8x422xf32> to vector<8x384xf32>
    %42 = vector.extract_strided_slice %34 {offsets = [0, 37], sizes = [8, 384], strides = [1, 1]} : vector<8x422xf32> to vector<8x384xf32>
    %43 = vector.extract_strided_slice %34 {offsets = [0, 38], sizes = [8, 384], strides = [1, 1]} : vector<8x422xf32> to vector<8x384xf32>
    %44 = tpu.concatenate %35, %36, %37, %38, %39, %40, %41, %42, %43 in 0 : vector<8x384xf32>, vector<8x384xf32>, vector<8x384xf32>, vector<8x384xf32>, vector<8x384xf32>, vector<8x384xf32>, vector<8x384xf32>, vector<8x384xf32>, vector<8x384xf32> -> vector<72x384xf32>
    %c0_27 = arith.constant 0 : index
    %c0_28 = arith.constant 0 : index
    %45 = vector.load %arg4[%c0_27, %c0_28] : memref<8x72xf32, #tpu.memory_space<vmem>>, vector<8x72xf32>
    %cst_29 = arith.constant dense<0.000000e+00> : vector<8x384xf32>
    %46 = tpu.matmul %45, %44, %cst_29 {dimension_numbers = #tpu.dot_dimension_numbers<[1], [0], [0], [1], [0, 0, 1, 1], [], []>} : vector<8x72xf32>, vector<72x384xf32>, vector<8x384xf32> -> vector<8x384xf32>
    %c0_30 = arith.constant 0 : index
    %c0_31 = arith.constant 0 : index
    %47 = vector.load %arg5[%c0_30, %c0_31] : memref<8x1xf32, #tpu.memory_space<vmem>>, vector<8x1xf32>
    %48 = vector.broadcast %47 : vector<8x1xf32> to vector<8x384xf32>
    %49 = arith.addf %46, %48 : vector<8x384xf32>
    %c0_32 = arith.constant 0 : index
    %c0_33 = arith.constant 0 : index
    %c38_34 = arith.constant 38 : index
    %50 = vector.load %arg1[%c0_32, %c0_33, %c38_34] : memref<1x8x460xf32, #tpu.memory_space<vmem>>, vector<1x8x384xf32>
    %51 = vector.shape_cast %50 : vector<1x8x384xf32> to vector<8x384xf32>
    %52 = arith.addf %51, %49 : vector<8x384xf32>
    %cst_35 = arith.constant 5.000000e-01 : f32
    %53 = vector.broadcast %cst_35 : f32 to vector<8x384xf32>
    %54 = arith.mulf %53, %52 : vector<8x384xf32>
    %cst_36 = arith.constant 0.707106769 : f32
    %55 = vector.broadcast %cst_36 : f32 to vector<8x384xf32>
    %56 = arith.mulf %52, %55 : vector<8x384xf32>
    %57 = math.erf %56 : vector<8x384xf32>
    %cst_37 = arith.constant 1.000000e+00 : f32
    %58 = vector.broadcast %cst_37 : f32 to vector<8x384xf32>
    %59 = arith.addf %58, %57 : vector<8x384xf32>
    %60 = arith.mulf %54, %59 : vector<8x384xf32>
    %c0_38 = arith.constant 0 : index
    %c0_39 = arith.constant 0 : index
    %c0_40 = arith.constant 0 : index
    %61 = vector.load %arg7[%c0_38, %c0_39, %c0_40] : memref<1x8x384xf32, #tpu.memory_space<vmem>>, vector<1x8x384xf32>
    %62 = vector.shape_cast %61 : vector<1x8x384xf32> to vector<8x384xf32>
    %63 = vector.shape_cast %60 : vector<8x384xf32> to vector<1x8x384xf32>
    tpu.vector_store %arg7[%c0_38, %c0_39, %c0_40], %63 {strides = array<i32>} : memref<1x8x384xf32, #tpu.memory_space<vmem>>, vector<1x8x384xf32>,
    return
  }
  func.func @transform_0(%arg0: i32) -> (i32, i32, i32) {
    %c0_i32 = arith.constant 0 : i32
    %c0_i32_0 = arith.constant 0 : i32
    %c0_i32_1 = arith.constant 0 : i32
    return %arg0, %c0_i32, %c0_i32_0 : i32, i32, i32
  }
  func.func @transform_1(%arg0: i32) -> (i32, i32) {
    %c0_i32 = arith.constant 0 : i32
    %c0_i32_0 = arith.constant 0 : i32
    %c0_i32_1 = arith.constant 0 : i32
    return %c0_i32, %c0_i32_0 : i32, i32
  }
  func.func @transform_2(%arg0: i32) -> (i32, i32) {
    %c0_i32 = arith.constant 0 : i32
    %c0_i32_0 = arith.constant 0 : i32
    %c0_i32_1 = arith.constant 0 : i32
    return %c0_i32, %c0_i32_0 : i32, i32
  }
  func.func @transform_3(%arg0: i32) -> (i32, i32) {
    %c0_i32 = arith.constant 0 : i32
    %c0_i32_0 = arith.constant 0 : i32
    %c0_i32_1 = arith.constant 0 : i32
    return %c0_i32, %c0_i32_0 : i32, i32
  }
  func.func @transform_4(%arg0: i32) -> (i32, i32) {
    %c0_i32 = arith.constant 0 : i32
    %c0_i32_0 = arith.constant 0 : i32
    %c0_i32_1 = arith.constant 0 : i32
    return %c0_i32, %c0_i32_0 : i32, i32
  }
  func.func @transform_5(%arg0: i32) -> (i32, i32) {
    %c0_i32 = arith.constant 0 : i32
    %c0_i32_0 = arith.constant 0 : i32
    %c0_i32_1 = arith.constant 0 : i32
    return %c0_i32, %c0_i32_0 : i32, i32
  }
  func.func @transform_6(%arg0: i32) -> (i32, i32, i32) {
    %c0_i32 = arith.constant 0 : i32
    %c0_i32_0 = arith.constant 0 : i32
    %c0_i32_1 = arith.constant 0 : i32
    return %arg0, %c0_i32, %c0_i32_0 : i32, i32, i32
  }
}

</mosaic_0001>

<bundles_post_ra>
// kernel: tpu_custom_call.1
= control target key start
LH: loop header
LB: loop body
LE: loop exit
PB: predicated region body
PF: predicated region fallthrough
CT: control target
= control target key end

     0   :  { %11 = vsyncpa [#allocation3], 0  ;;  %s1816_s0 = inlined_call_operand.hbm [shape: f32[2,8,460], index: 0, kind: input, shape index: {}]   ;;  %s1817_s1 = inlined_call_operand.vmem [shape: f32[8,72], index: 1, kind: input, shape index: {}]   ;;  %s1818_s2 = inlined_call_operand.vmem [shape: f32[8,1], index: 2, kind: input, shape index: {}]   ;;  %s1819_s3 = inlined_call_operand.vmem [shape: f32[8,72], index: 3, kind: input, shape index: {}]   ;;  %s1820_s4 = inlined_call_operand.vmem [shape: f32[8,1], index: 4, kind: input, shape index: {}]   ;;  %s1821_s5 = inlined_call_operand.vmem [shape: f32[1,422], index: 5, kind: input, shape index: {}]   ;;  %s1822_s6 = inlined_call_operand.hbm [shape: f32[2,8,384], index: 6, kind: output, shape index: {}]  }
   0x1   :  { %13 = vsyncpa [#allocation3 + $0x1], 0 }
   0x2   :  { %14 = vsyncpa [#allocation4], 0 }
   0x3   :  { %16 = vsyncpa [#allocation4 + $0x1], 0  ;;  %s1489_s21 = smov 0   ;;  %s1491_s22 = smov 0  }
   0x4   :  { %s1493_s23 = smov 0   ;;  %s1495_s24 = smov 0  }
   0x5 LB: > { %s1510_s25 = sadd.s32 4294967295, %s1437_s24   ;;  %s1016_s26 = sadd.s32 4294967294, %s1437_s24   ;;  %s1437_s24 = sphi %s1495_s24, %s1837_s24   ;;  %s1433_s23 = sphi %s1493_s23, %s1836_s23   ;;  %s1429_s22 = sphi %s1491_s22, %s1835_s22   ;;  %s1425_s21 = sphi %s1489_s21, %s1834_s21  }
   0x6   : > { %s1514_s27 = sadd.s32 1, %s1437_s24   ;;  %s29_s28 = sadd.s32 1, %s1433_s23 }
   0x7   : > { %s26_s29 = ssub.s32 %s1437_s24, %s1514_s27  ;;  %p36_p0 = scmp.ne.s32.totalorder %s1433_s23, %s1429_s22 }
   0x8   : > { %p27_p1 = scmp.eq.s32.totalorder %s26_s29, 0  ;;  %p37_p2 = scmp.eq.s32.totalorder %s1437_s24, 0 }
   0x9   : > { %p42_p3 = scmp.ne.s32.totalorder %s1429_s22, %s1425_s21  ;;  %p43_p4 = scmp.eq.s32.totalorder %s1510_s25, 0 }
   0xa   : > { %s1526_s30 = scalar_select %p27_p1, %s1433_s23, %s29_s28  }
   0xb   : > { %p1528_p5 = por %p37_p2, %p36_p0  ;;  %p1532_p6 = por %p43_p4, %p42_p3 }
   0xc   : > { %p171_p7 = scmp.eq.s32.totalorder %s1510_s25, 1  ;;  %p177_p8 = scmp.eq.s32.totalorder %s1016_s26, 1 }
   0xd   : > { %p1137_p10 = scmp.lt.s32.totalorder %s1437_s24, 2  ;;  %s212_s11 = sand.u32 1, %s1433_s23  }
   0xe   : > { %p1539_p11 = por %p171_p7, %p36_p0  ;;  %p1543_p12 = por %p177_p8, %p42_p3 }
   0xf   : > { %s1031_s12 = sshll.u32 %s1437_s24, 9  ;;  %s1019_s13 = sshll.u32 %s212_s11, 5 }
  0x10   : > { %s1826_s9 = scalar_select %p1539_p11, 1, 0 }
  0x11   : > { %s1827_s10 = scalar_select %p1543_p12, 1, 0 }
  0x12   : > { %s1552_s16 = scalar_lea.hbm %s1816_s0, %s1031_s12  ;;  %s216_s17 = scalar_lea.vmem [#allocation2], %s1019_s13 }
  0x13   : > { %s224_s18 = sshll.u32 %s216_s17, 4  ;;  %p1556_p13 = pnand %p1137_p10, %p1528_p5  ;;  %s1560_s18 = int_to_ptr.vmem [resolvable:$true] %s224_s18 }
  0x14   : > { %s213_s20 = scalar_lea.sflag [#allocation3], %s212_s11  ;;  %s1341_s26 = scalar_lea.hbm %s1552_s16, 512 }
  0x15   : > { %p1342_p2 = scmp.ne.s32.totalorder %s1552_s16, %s1341_s26  ;;  %p1343_p3 = pneg %p1556_p13 }
  0x16   : > { %s1346_s7 = scalar_lea.hbm %s1816_s0, 1024  ;;  %p1347_p5 = scmp.lt.u32.totalorder %s1552_s16, %s1816_s0 }
  0x17   : > { %p1344_p4 = pnand %p1343_p3, %p1342_p2  ;;  %p1348_p8 = scmp.lt.u32.totalorder %s1346_s7, %s1341_s26 }
  0x18   : > { %p1350_p9 = scmp.lt.u32.totalorder %s1341_s26, %s1552_s16 }
  0x19   : > { %p1345_p7 = pneg %p1344_p4  ;;  %p1349_p10 = por %p1348_p8, %p1347_p5 }
  0x1b   : > { %p1351_p0 = por %p1350_p9, %p1349_p10 }
  0x1d   : > { %p1352_p1 = pnand %p1351_p0, %p1345_p7 }
  0x1f   : > { %1355 = shalt.err (!%p1352_p1)
}
  0x20   : > { %s1356_s11 = scalar_lea.vmem %s1560_s18, 512  ;;  %s1439_s14 = smov [#allocation2]  }
  0x21   : > { %p1357_p2 = scmp.ne.s32.totalorder %s1560_s18, %s1356_s11  ;;  %s1361_s15 = sshll.u32 %s1439_s14, 4  ;;  %s1362_s15 = int_to_ptr.vmem [resolvable:$false] %s1361_s15 }
  0x22   : > { %s1363_s17 = scalar_lea.vmem %s1362_s15, 1024  ;;  %p1364_p11 = scmp.lt.s32.totalorder %s1560_s18, %s1362_s15 }
  0x23   : > { %p1359_p4 = pnand %p1357_p2, %p1343_p3  ;;  %p1365_p5 = scmp.lt.s32.totalorder %s1363_s17, %s1356_s11 }
  0x25   : > { %p1360_p12 = pneg %p1359_p4  ;;  %p1366_p8 = por %p1365_p5, %p1364_p11 }
  0x27   : > { %p1367_p9 = pnand %p1366_p8, %p1360_p12 }
  0x29   : > { %1370 = shalt.err (!%p1367_p9)
}
  0x2a   : > { %1132 = dma.hbm_to_vmem [thread:$0]  (!%p1556_p13), %s1552_s16, 512, %s1560_s18, %s213_s20  }
  0x2b   : > { %p1829_p0 = scmp.lt.s32.totalorder %s1437_s24, 3  ;;  %p1830_p1 = scmp.ge.s32.totalorder %s1437_s24, 1 }
  0x2d   : > { %p230_p3 = pnand %p1830_p1, %p1829_p0 }
  0x2e   : > { %s1594_s26 = sand.u32 (!%p230_p3), 1, %s1429_s22  }
  0x2f   : > { %233 = sbr.rel (%p230_p3) target bundleno = 1082 (0x43a), region = 44  ;;  %s1023_s28 = sshll.u32 (!%p230_p3), %s1594_s26, 5 }
  0x30   : > { %s236_s29 = scalar_lea.sflag (!%p230_p3), [#allocation3], %s1594_s26  ;;  %s239_s7 = scalar_lea.vmem (!%p230_p3), [#allocation2], %s1023_s28 }
  0x36   : > { %1416 = dma.done.wait (%p1532_p6), %s236_s29, 512  }
  0x37   : > { %1418 = vsyncadd (%p1532_p6), %s236_s29, 4294966784  ;;  %v1602_v0 = vld [vmem:[%s239_s7 + $0x8] sm:$0xff]  ;;  %v1604_v1 = vld [vmem:[%s239_s7 + $0x10] sm:$0xff]  ;;  %s1440_s16 = smov 126   ;;  %s1441_s18 = smov 127   ;;  %v1447_v6 = vmov 0.0  }
  0x38   : > { %v1606_v2 = vld [vmem:[%s239_s7] sm:$0xff]  ;;  %v1194_v3 = vpack.i.bf16 %v1604_v1, %v1602_v0  ;;  %v1610_v4 = vld [vmem:[%s239_s7 + $0x18] sm:$0xff]  ;;  %s1442_s8 = smov 110   ;;  %s1443_s19 = smov 108   ;;  %479 = vmatprep.mubr.f32.mxu0 %v1447_v6  ;;  %550 = vmatprep.mubr.f32.mxu1 %v1447_v6  ;;  %v1448_v7 = vmov 0   ;;  %vm284_vm0 = vcmask 1039360  }
  0x39   : > { %v1189_v5 = vpack.i.bf16 %v1610_v4, %v1606_v2  ;;  %s1444_s20 = smov 109   ;;  %s1445_s12 = smov 91   ;;  %1254 = vset.pattern.permute.xlu0 %v1448_v7  ;;  %v405_v8 = vld [vmem:[%s1818_s2] sm:$0xff]  ;;  %vm300_vm1 = vcmask 1031168   ;;  %vm316_vm2 = vcmask 900096   ;;  %vm332_vm3 = vcmask 891904  }
  0x3a   : > { %1195 = vrot.lane.b32.xlu1 %v1194_v3, %s1440_s16  ;;  %1185 = vrot.lane.b32.xlu0 %v1194_v3, %s1441_s18  ;;  %s1446_s13 = smov 92   ;;  %s1449_s11 = smov 90   ;;  %vm348_vm4 = vcmask 883712   ;;  %vm364_vm5 = vcmask 752640   ;;  %vm380_vm6 = vcmask 744448   ;;  %vm396_vm7 = vcmask 736256  }
  0x3b   : > { %vm411_vm8 = vcmask 588800   ;;  %vm1451_vm9 = vmmov 0   ;;  %vm879_vm10 = vcmask 310272   ;;  %p1831_p11 = scmp.ne.s32.totalorder %s1826_s9, 0  ;;  %s1453_s7 = smov [#allocation5]  }
  0x3e   : > { %1200 = vrot.lane.b32.xlu1 %v1194_v3, %s1442_s8  ;;  %1190 = vrot.lane.b32.xlu0 %v1189_v5, %s1441_s18 }
  0x42   : > { %1210 = vrot.lane.b32.xlu1 %v1189_v5, %s1442_s8  ;;  %1205 = vrot.lane.b32.xlu0 %v1189_v5, %s1440_s16 }
  0x46   : > { %1220 = vrot.lane.b32.xlu1 %v1194_v3, %s1443_s19  ;;  %1215 = vrot.lane.b32.xlu0 %v1194_v3, %s1444_s20 }
  0x4a   : > { %1230 = vrot.lane.b32.xlu1 %v1189_v5, %s1443_s19  ;;  %1225 = vrot.lane.b32.xlu0 %v1189_v5, %s1444_s20 }
  0x4e   : > { %1240 = vrot.lane.b32.xlu1 %v1194_v3, %s1445_s12  ;;  %1235 = vrot.lane.b32.xlu0 %v1194_v3, %s1446_s13 }
  0x52   : > { %1250 = vrot.lane.b32.xlu1 %v1189_v5, %s1445_s12  ;;  %1245 = vrot.lane.b32.xlu0 %v1189_v5, %s1446_s13 }
  0x56   : > { %392 = vrot.lane.b32.xlu1 %v1604_v1, %s1449_s11  ;;  %390 = vrot.lane.b32.xlu0 %v1602_v0, %s1449_s11 }
  0x5a   : > { %394 = vrot.lane.b32.xlu1 %v1610_v4, %s1449_s11  ;;  %388 = vrot.lane.b32.xlu0 %v1606_v2, %s1449_s11 }
  0x5e   : > { %408 = vperm.xlu0 %1254, %v405_v8  }
  0xac   : > { %v1196_v9 = vpop.permute.xlu1 %1195  ;;  %v1186_v10 = vpop.permute.xlu0 %1185 }
  0xad   : > { %v1188_v11 = vunpack.i.h.bf16 %v1186_v10  ;;  %v1187_v12 = vunpack.i.l.bf16 %v1186_v10  ;;  %v1198_v13 = vunpack.i.h.bf16 %v1196_v9  ;;  %v1197_v14 = vunpack.i.l.bf16 %v1196_v9 }
  0xaf   : > { %v286_v15 = vsel %vm284_vm0, %v1187_v12, %v1188_v11  ;;  %v302_v23 = vsel %vm300_vm1, %v1197_v14, %v1198_v13 }
  0xb0   : > { %v1201_v16 = vpop.permute.xlu1 %1200  ;;  %v1191_v17 = vpop.permute.xlu0 %1190  ;;  %v1063_v18 = vpack.c.bf16 %v286_v15, %v1602_v0 }
  0xb1   : > { %v1203_v19 = vunpack.i.h.bf16 %v1201_v16  ;;  %v1202_v20 = vunpack.i.l.bf16 %v1201_v16  ;;  %v1193_v21 = vunpack.i.h.bf16 %v1191_v17  ;;  %v1192_v22 = vunpack.i.l.bf16 %v1191_v17 }
  0xb2   : > { %1064 = vmatprep.subr.bf16.mxu0 %v1063_v18 }
  0xb3   : > { %v1079_v24 = vpack.c.bf16 %v1193_v21, %v1610_v4  ;;  %v285_v25 = vsel %vm284_vm0, %v1192_v22, %v1187_v12  ;;  %v287_v26 = vsel %vm284_vm0, %v1188_v11, %v1193_v21  ;;  %v318_v27 = vsel %vm316_vm2, %v1202_v20, %v1203_v19 }
  0xb4   : > { %v1211_v28 = vpop.permute.xlu1 %1210  ;;  %v1206_v29 = vpop.permute.xlu0 %1205  ;;  %v1065_v30 = vpack.c.bf16 %v285_v25, %v1606_v2  ;;  %v1081_v31 = vpack.c.bf16 %v287_v26, %v1604_v1  ;;  %v1067_v32 = vpack.c.bf16 %v318_v27, %v302_v23 }
  0xb5   : > { %v1213_v33 = vunpack.i.h.bf16 %v1211_v28  ;;  %v1212_v34 = vunpack.i.l.bf16 %v1211_v28  ;;  %v1208_v35 = vunpack.i.h.bf16 %v1206_v29  ;;  %v1207_v36 = vunpack.i.l.bf16 %v1206_v29  ;;  %1080 = vmatprep.subr.bf16.mxu1 %v1079_v24 }
  0xb6   : > { %1066 = vmatpush1.bf16.msra.mxu0 %v1065_v30  ;;  %1082 = vmatpush1.bf16.msra.mxu1 %v1081_v31 }
  0xb7   : > { %v1083_v37 = vpack.c.bf16 %v1213_v33, %v1208_v35  ;;  %1068 = vmatprep.subr.bf16.mxu0 %v1067_v32  ;;  %v301_v38 = vsel %vm300_vm1, %v1207_v36, %v1197_v14  ;;  %v317_v39 = vsel %vm316_vm2, %v1212_v34, %v1202_v20  ;;  %v303_v40 = vsel %vm300_vm1, %v1198_v13, %v1208_v35  ;;  %v404_v34 = vld [vmem:[%s1817_s1] sm:$0xff] }
  0xb8   : > { %v1221_v41 = vpop.permute.xlu1 %1220  ;;  %v1216_v42 = vpop.permute.xlu0 %1215  ;;  %v1069_v43 = vpack.c.bf16 %v317_v39, %v301_v38  ;;  %v319_v44 = vsel %vm316_vm2, %v1203_v19, %v1213_v33 }
  0xb9   : > { %v1223_v45 = vunpack.i.h.bf16 %v1221_v41  ;;  %v1222_v46 = vunpack.i.l.bf16 %v1221_v41  ;;  %v1218_v47 = vunpack.i.h.bf16 %v1216_v42  ;;  %v1217_v48 = vunpack.i.l.bf16 %v1216_v42  ;;  %1084 = vmatprep.subr.bf16.mxu1 %v1083_v37 }
  0xba   : > { %1070 = vmatpush1.bf16.msra.mxu0 %v1069_v43  ;;  %v1085_v49 = vpack.c.bf16 %v319_v44, %v303_v40 }
  0xbb   : > { %v334_v50 = vsel %vm332_vm3, %v1217_v48, %v1218_v47  ;;  %v350_v51 = vsel %vm348_vm4, %v1222_v46, %v1223_v45 }
  0xbc   : > { %1086 = vmatpush1.bf16.msra.mxu1 %v1085_v49  ;;  %v1231_v52 = vpop.permute.xlu1 %1230  ;;  %v1226_v53 = vpop.permute.xlu0 %1225  ;;  %v1071_v54 = vpack.c.bf16 %v350_v51, %v334_v50 }
  0xbd   : > { %v1233_v55 = vunpack.i.h.bf16 %v1231_v52  ;;  %v1232_v56 = vunpack.i.l.bf16 %v1231_v52  ;;  %v1228_v57 = vunpack.i.h.bf16 %v1226_v53  ;;  %v1227_v58 = vunpack.i.l.bf16 %v1226_v53  ;;  %v577_v53 = vld [vmem:[%s1821_s5] sm:$0xf] }
  0xbe   : > { %1072 = vmatprep.subr.bf16.mxu0 %v1071_v54 }
  0xbf   : > { %v1087_v59 = vpack.c.bf16 %v1233_v55, %v1228_v57  ;;  %v333_v60 = vsel %vm332_vm3, %v1227_v58, %v1217_v48  ;;  %v349_v61 = vsel %vm348_vm4, %v1232_v56, %v1222_v46  ;;  %v335_v62 = vsel %vm332_vm3, %v1218_v47, %v1228_v57 }
  0xc0   : > { %v1241_v63 = vpop.permute.xlu1 %1240  ;;  %v1236_v3 = vpop.permute.xlu0 %1235  ;;  %v1073_v5 = vpack.c.bf16 %v349_v61, %v333_v60  ;;  %v351_v7 = vsel %vm348_vm4, %v1223_v45, %v1233_v55  ;;  %v579_v47 = vlaneseq }
  0xc1   : > { %v1243_v8 = vunpack.i.h.bf16 %v1241_v63  ;;  %v1242_v9 = vunpack.i.l.bf16 %v1241_v63  ;;  %v1238_v10 = vunpack.i.h.bf16 %v1236_v3  ;;  %v1237_v11 = vunpack.i.l.bf16 %v1236_v3  ;;  %1088 = vmatprep.subr.bf16.mxu1 %v1087_v59 }
  0xc2   : > { %1074 = vmatpush1.bf16.msra.mxu0 %v1073_v5  ;;  %v1089_v12 = vpack.c.bf16 %v351_v7, %v335_v62  ;;  %v580_v51 = vshrl.u32 %v579_v47, 7 }
  0xc3   : > { %v366_v13 = vsel %vm364_vm5, %v1237_v11, %v1238_v10  ;;  %v382_v14 = vsel %vm380_vm6, %v1242_v9, %v1243_v8 }
  0xc4   : > { %1090 = vmatpush1.bf16.msra.mxu1 %v1089_v12  ;;  %v1251_v15 = vpop.permute.xlu1 %1250  ;;  %v1246_v16 = vpop.permute.xlu0 %1245  ;;  %v1075_v17 = vpack.c.bf16 %v382_v14, %v366_v13  ;;  %v581_v52 = vsub.s32 0, %v580_v51  ;;  %v593_v55 = vsub.s32 3, %v580_v51 }
  0xc5   : > { %v1253_v18 = vunpack.i.h.bf16 %v1251_v15  ;;  %v1252_v19 = vunpack.i.l.bf16 %v1251_v15  ;;  %v1248_v20 = vunpack.i.h.bf16 %v1246_v16  ;;  %v1247_v21 = vunpack.i.l.bf16 %v1246_v16 }
  0xc6   : > { %1076 = vmatprep.subr.bf16.mxu0 %v1075_v17  ;;  %v582_v58 = vrot.slane %v577_v53, %v581_v52  ;;  %v594_v63 = vrot.slane %v577_v53, %v593_v55 }
  0xc7   : > { %v1091_v22 = vpack.c.bf16 %v1253_v18, %v1248_v20  ;;  %v365_v23 = vsel %vm364_vm5, %v1247_v21, %v1237_v11  ;;  %v381_v24 = vsel %vm380_vm6, %v1252_v19, %v1242_v9  ;;  %v367_v25 = vsel %vm364_vm5, %v1238_v10, %v1248_v20 }
  0xc8   : > { %v393_v26 = vpop.permute.xlu1 %392  ;;  %v391_v27 = vpop.permute.xlu0 %390  ;;  %v1077_v28 = vpack.c.bf16 %v381_v24, %v365_v23  ;;  %v383_v29 = vsel %vm380_vm6, %v1243_v8, %v1253_v18  ;;  %v589_v10 = vsub.s32 2, %v580_v51  ;;  %v585_v11 = vsub.s32 1, %v580_v51 }
  0xc9   : > { %1092 = vmatprep.subr.bf16.mxu1 %v1091_v22  ;;  %v1093_v30 = vpack.c.bf16 %v383_v29, %v367_v25  ;;  %v398_v31 = vsel %vm396_vm7, %v391_v27, %v393_v26  ;;  %v1450_v23 = vmov 0.0|0.0   ;;  %v720_v25 = vld [vmem:[%s1820_s4] sm:$0xff] }
  0xca   : > { %1078 = vmatpush1.bf16.msra.mxu0 %v1077_v28  ;;  %v590_v17 = vrot.slane %v577_v53, %v589_v10  ;;  %v586_v18 = vrot.slane %v577_v53, %v585_v11 }
  0xcb   : > { %1094 = vmatpush1.bf16.msra.mxu1 %v1093_v30  ;;  %431 = vmatprep.subr.mxu0 %v398_v31 }
  0xcc   : > { %v395_v32 = vpop.permute.xlu1 %394  ;;  %v389_v33 = vpop.permute.xlu0 %388 }
  0xcd   : > { %502 = vmatprep.subr.mxu1 %v395_v32  ;;  %v397_v35 = vsel %vm396_vm7, %v389_v33, %v391_v27  ;;  %v399_v36 = vsel %vm396_vm7, %v393_v26, %v395_v32 }
  0xce   : > { %432 = vmatpush1.msra.mxu0 %v397_v35 }
  0xcf   : > { %503 = vmatpush1.msra.mxu1 %v399_v36  ;;  %1024 = vmatmul.mubr.msk.f32.vlgmr.msra.gmra.mrb[0].mxu0 %vm411_vm8, %v404_v34 }
  0xd0   : > { %1025 = vmatmul.mubr.msk.f32.vlgmr.msra.gmra.mrb[0].mxu1 %vm411_vm8, %v404_v34  ;;  %793 = vmatprep.mubr.f32.mxu0 %v1447_v6 }
  0xd1   : > { %1111 = vmatprep.subr.bf16.mxu1 %v1450_v23  ;;  %1060 = vmatprep.mubr.msk.f32.mxu1 %vm1451_vm9, %v1447_v6 }
  0xdd   : > { %v409_v37 = vpop.permute.xlu0 %408 }
 0x1a2   : > { %v481_v38 = vpop.f32.mrb[0].mxu0 }
 0x1a3   : > { %v482_v39 = vadd.f32 %v481_v38, %v409_v37  ;;  %v552_v40 = vpop.f32.mrb[0].mxu1  ;;  %v483_v41 = vpop.f32.mrb[1].mxu0 }
 0x1a4   : > { %v554_v42 = vpop.f32.mrb[1].mxu1  ;;  %v553_v44 = vadd.f32 %v552_v40, %v409_v37  ;;  %v484_v46 = vadd.f32 %v483_v41, %v409_v37 }
 0x1a5   : > { %v561_v43 = vmul.f32 0.70710677, %v482_v39  ;;  %v555_v45 = vadd.f32 %v554_v42, %v409_v37  ;;  %v557_v56 = vmul.f32 0.5, %v482_v39 }
 0x1a6   : > { %v563_v49 = vmul.f32 0.70710677, %v553_v44  ;;  %v562_v50 = vmul.f32 0.70710677, %v484_v46  ;;  %v559_v15 = vmul.f32 0.5, %v553_v44  ;;  %v558_v16 = vmul.f32 0.5, %v484_v46 }
 0x1a7   : > { %1325 = verf.f32 %v561_v43  ;;  %v564_v48 = vmul.f32 0.70710677, %v555_v45  ;;  %v560_v61 = vmul.f32 0.5, %v555_v45 }
 0x1a9   : > { %1327 = verf.f32 %v564_v48 }
 0x1aa   : > { %1329 = verf.f32 %v563_v49 }
 0x1ab   : > { %1331 = verf.f32 %v562_v50 }
 0x1b1   : > { %v1326_v54 = vpop.eup %1325 }
 0x1b2   : > { %v569_v57 = vadd.f32 1.0, %v1326_v54 }
 0x1b3   : > { %v1328_v59 = vpop.eup %1327 }
 0x1b4   : > { %v573_v60 = vmul.f32 %v569_v57, %v557_v56  ;;  %v572_v62 = vadd.f32 1.0, %v1328_v59  ;;  %v1330_v3 = vpop.eup %1329 }
 0x1b5   : > { %v1332_v8 = vpop.eup %1331  ;;  %v571_v12 = vadd.f32 1.0, %v1330_v3 }
 0x1b6   : > { %v1678_v5 = vmul.f32 %v582_v58, %v573_v60  ;;  %v576_v7 = vmul.f32 %v572_v62, %v560_v61  ;;  %v570_v13 = vadd.f32 1.0, %v1332_v8 }
 0x1b7   : > { %v575_v19 = vmul.f32 %v571_v12, %v559_v15 }
 0x1b8   : > { %v602_v9 = vmul.f32 %v594_v63, %v576_v7  ;;  %v574_v20 = vmul.f32 %v570_v13, %v558_v16 }
 0x1b9   : > { %v601_v21 = vmul.f32 %v590_v17, %v575_v19 }
 0x1ba   : > { %v1260_v14 = vpack.i.bf16 %v602_v9, %v1678_v5  ;;  %v1685_v22 = vmul.f32 %v586_v18, %v574_v20 }
 0x1bc   : > { %1261 = vrot.lane.b32.xlu0 %v1260_v14, %s1440_s16  ;;  %1256 = vrot.lane.b32.xlu1 %v1260_v14, %s1441_s18  ;;  %v1295_v24 = vpack.i.bf16 %v601_v21, %v1685_v22 }
 0x1c0   : > { %1271 = vrot.lane.b32.xlu0 %v1260_v14, %s1444_s20  ;;  %1266 = vrot.lane.b32.xlu1 %v1260_v14, %s1442_s8 }
 0x1c4   : > { %1281 = vrot.lane.b32.xlu0 %v1260_v14, %s1446_s13  ;;  %1276 = vrot.lane.b32.xlu1 %v1260_v14, %s1443_s19 }
 0x1c8   : > { %1296 = vrot.lane.b32.xlu0 %v1295_v24, %s1440_s16  ;;  %1286 = vrot.lane.b32.xlu1 %v1260_v14, %s1445_s12  ;;  %s1375_s16 = sshll.u32 %s1453_s7, 4  ;;  %s1376_s16 = int_to_ptr.vmem [resolvable:$false] %s1375_s16 }
 0x1cc   : > { %1306 = vrot.lane.b32.xlu0 %v1295_v24, %s1444_s20  ;;  %1291 = vrot.lane.b32.xlu1 %v1295_v24, %s1441_s18  ;;  %s1377_s20 = scalar_lea.vmem %s1376_s16, 768 }
 0x1d0   : > { %1316 = vrot.lane.b32.xlu0 %v1295_v24, %s1446_s13  ;;  %1301 = vrot.lane.b32.xlu1 %v1295_v24, %s1442_s8  ;;  %s1124_s13 = smul.u32 384, %s1510_s25  ;;  %s932_s25 = scalar_lea.sflag [#allocation4], %s1594_s26 }
 0x1d2   : > { %s1771_s29 = scalar_lea.hbm %s1822_s6, %s1124_s13 }
 0x1d4   : > { %707 = vrot.lane.b32.xlu0 %v1685_v22, %s1449_s11  ;;  %1311 = vrot.lane.b32.xlu1 %v1295_v24, %s1443_s19  ;;  %s1452_s19 = smov 38  }
 0x1d8   : > { %705 = vrot.lane.b32.xlu0 %v1678_v5, %s1449_s11  ;;  %1321 = vrot.lane.b32.xlu1 %v1295_v24, %s1445_s12  ;;  %s1123_s12 = smul.u32 24, %s1594_s26 }
 0x1da   : > { %s267_s14 = scalar_lea.vmem [#allocation5], %s1123_s12 }
 0x1db   : > { %s946_s15 = sshll.u32 %s267_s14, 4  ;;  %s1773_s15 = int_to_ptr.vmem [resolvable:$true] %s946_s15 }
 0x1dc   : > { %723 = vperm.xlu0 %1254, %v720_v25   ;;  %709 = vrot.lane.b32.xlu1 %v601_v21, %s1449_s11  ;;  %p1378_p7 = scmp.lt.s32.totalorder %s1773_s15, %s1376_s16 }
 0x1e0   : > { %711 = vrot.lane.b32.xlu1 %v602_v9, %s1449_s11 }
 0x22e   : > { %v1262_v26 = vpop.permute.xlu0 %1261  ;;  %v1257_v27 = vpop.permute.xlu1 %1256 }
 0x22f   : > { %v1259_v35 = vunpack.i.h.bf16 %v1257_v27  ;;  %v1258_v36 = vunpack.i.l.bf16 %v1257_v27  ;;  %v1264_v40 = vunpack.i.h.bf16 %v1262_v26  ;;  %v1263_v41 = vunpack.i.l.bf16 %v1262_v26 }
 0x232   : > { %v1709_v28 = vpop.permute.xlu0 %1271  ;;  %v1267_v29 = vpop.permute.xlu1 %1266 }
 0x233   : > { %v1274_v42 = vunpack.i.h.bf16 %v1709_v28  ;;  %v1273_v43 = vunpack.i.l.bf16 %v1709_v28  ;;  %v1269_v47 = vunpack.i.h.bf16 %v1267_v29  ;;  %v1268_v52 = vunpack.i.l.bf16 %v1267_v29 }
 0x236   : > { %v1711_v30 = vpop.permute.xlu0 %1281  ;;  %v1277_v31 = vpop.permute.xlu1 %1276 }
 0x237   : > { %v1279_v56 = vunpack.i.h.bf16 %v1277_v31  ;;  %v1278_v60 = vunpack.i.l.bf16 %v1277_v31  ;;  %v1284_v15 = vunpack.i.h.bf16 %v1711_v30 }
 0x23a   : > { %v1297_v32 = vpop.permute.xlu0 %1296  ;;  %v1713_v33 = vpop.permute.xlu1 %1286 }
 0x23b   : > { %v1299_v44 = vunpack.i.h.bf16 %v1297_v32  ;;  %v1298_v48 = vunpack.i.l.bf16 %v1297_v32  ;;  %v1289_v24 = vunpack.i.h.bf16 %v1713_v33  ;;  %v1288_v29 = vunpack.i.l.bf16 %v1713_v33 }
 0x23d   : > { %v631_v61 = vsel %vm300_vm1, %v1299_v44, %v1264_v40  ;;  %v630_v9 = vsel %vm300_vm1, %v1298_v48, %v1299_v44 }
 0x23e   : > { %v1292_v34 = vpop.permute.xlu1 %1291  ;;  %v1307_v37 = vpop.permute.xlu0 %1306 }
 0x23f   : > { %v1294_v38 = vunpack.i.h.bf16 %v1292_v34  ;;  %v1293_v39 = vunpack.i.l.bf16 %v1292_v34  ;;  %v1309_v57 = vunpack.i.h.bf16 %v1307_v37  ;;  %v1308_v58 = vunpack.i.l.bf16 %v1307_v37 }
 0x241   : > { %v615_v45 = vsel %vm284_vm0, %v1258_v36, %v1293_v39  ;;  %v617_v46 = vsel %vm284_vm0, %v1294_v38, %v1259_v35  ;;  %v616_v51 = vsel %vm284_vm0, %v1293_v39, %v1294_v38  ;;  %v659_v16 = vsel %vm332_vm3, %v1309_v57, %v1274_v42 }
 0x242   : > { %v1112_v49 = vpack.c.bf16 %v617_v46, %v601_v21  ;;  %v1302_v50 = vpop.permute.xlu1 %1301  ;;  %v1097_v53 = vpack.c.bf16 %v615_v45, %v1678_v5  ;;  %v1095_v59 = vpack.c.bf16 %v616_v51, %v1685_v22  ;;  %v1317_v62 = vpop.permute.xlu0 %1316  ;;  %v629_v5 = vsel %vm300_vm1, %v1263_v41, %v1298_v48 }
 0x243   : > { %v1304_v54 = vunpack.i.h.bf16 %v1302_v50  ;;  %v1303_v55 = vunpack.i.l.bf16 %v1302_v50  ;;  %v1319_v17 = vunpack.i.h.bf16 %v1317_v62  ;;  %v658_v18 = vsel %vm332_vm3, %v1308_v58, %v1309_v57 }
 0x244   : > { %1113 = vmatpush3.bf16.msra.mxu1 %v1112_v49  ;;  %1096 = vmatprep.subr.bf16.mxu0 %v1095_v59  ;;  %v1318_v19 = vunpack.i.l.bf16 %v1317_v62  ;;  %v657_v25 = vsel %vm332_vm3, %v1273_v43, %v1308_v58  ;;  %v1283_v35 = vunpack.i.l.bf16 %v1711_v30 }
 0x245   : > { %v643_v63 = vsel %vm316_vm2, %v1268_v52, %v1303_v55  ;;  %v645_v3 = vsel %vm316_vm2, %v1304_v54, %v1269_v47  ;;  %1114 = vmatprep.subr.bf16.mxu1 %v1450_v23  ;;  %v644_v10 = vsel %vm316_vm2, %v1303_v55, %v1304_v54  ;;  %1098 = vmatpush1.bf16.msra.mxu0 %v1097_v53 }
 0x246   : > { %v1115_v7 = vpack.c.bf16 %v645_v3, %v631_v61  ;;  %v1312_v8 = vpop.permute.xlu1 %1311  ;;  %v1101_v11 = vpack.c.bf16 %v643_v63, %v629_v5  ;;  %v1099_v14 = vpack.c.bf16 %v644_v10, %v630_v9  ;;  %v687_v36 = vsel %vm364_vm5, %v1319_v17, %v1284_v15  ;;  %v708_v37 = vpop.permute.xlu0 %707 }
 0x247   : > { %v1314_v12 = vunpack.i.h.bf16 %v1312_v8  ;;  %v1313_v13 = vunpack.i.l.bf16 %v1312_v8  ;;  %v686_v40 = vsel %vm364_vm5, %v1318_v19, %v1319_v17  ;;  %v685_v41 = vsel %vm364_vm5, %v1283_v35, %v1318_v19 }
 0x248   : > { %1116 = vmatpush3.bf16.msra.mxu1 %v1115_v7  ;;  %1100 = vmatprep.subr.bf16.mxu0 %v1099_v14 }
 0x249   : > { %v671_v20 = vsel %vm348_vm4, %v1278_v60, %v1313_v13  ;;  %v673_v21 = vsel %vm348_vm4, %v1314_v12, %v1279_v56  ;;  %1117 = vmatprep.subr.bf16.mxu1 %v1450_v23  ;;  %v672_v22 = vsel %vm348_vm4, %v1313_v13, %v1314_v12  ;;  %1102 = vmatpush1.bf16.msra.mxu0 %v1101_v11 }
 0x24a   : > { %v1118_v26 = vpack.c.bf16 %v673_v21, %v659_v16  ;;  %v1322_v27 = vpop.permute.xlu1 %1321  ;;  %v1103_v28 = vpack.c.bf16 %v672_v22, %v658_v18  ;;  %v1105_v31 = vpack.c.bf16 %v671_v20, %v657_v25  ;;  %v706_v46 = vpop.permute.xlu0 %705 }
 0x24b   : > { %v1324_v32 = vunpack.i.h.bf16 %v1322_v27  ;;  %v1323_v34 = vunpack.i.l.bf16 %v1322_v27  ;;  %v713_v49 = vsel %vm396_vm7, %v706_v46, %v708_v37 }
 0x24c   : > { %1104 = vmatprep.subr.bf16.mxu0 %v1103_v28  ;;  %1119 = vmatpush3.bf16.msra.mxu1 %v1118_v26 }
 0x24d   : > { %v699_v38 = vsel %vm380_vm6, %v1288_v29, %v1323_v34  ;;  %v701_v39 = vsel %vm380_vm6, %v1324_v32, %v1289_v24  ;;  %1120 = vmatprep.subr.bf16.mxu1 %v1450_v23  ;;  %v700_v33 = vsel %vm380_vm6, %v1323_v34, %v1324_v32  ;;  %1106 = vmatpush1.bf16.msra.mxu0 %v1105_v31  ;;  %v719_v23 = vld [vmem:[%s1819_s3] sm:$0xff] }
 0x24e   : > { %v1121_v42 = vpack.c.bf16 %v701_v39, %v687_v36  ;;  %v710_v43 = vpop.permute.xlu1 %709  ;;  %v1107_v30 = vpack.c.bf16 %v700_v33, %v686_v40  ;;  %v1109_v44 = vpack.c.bf16 %v699_v38, %v685_v41 }
 0x24f   : > { %v714_v48 = vsel %vm396_vm7, %v708_v37, %v710_v43 }
 0x250   : > { %1108 = vmatprep.subr.bf16.mxu0 %v1107_v30  ;;  %1122 = vmatpush3.bf16.msra.mxu1 %v1121_v42 }
 0x251   : > { %1058 = vmatprep.subr.mxu1 %v1447_v6  ;;  %1110 = vmatpush1.bf16.msra.mxu0 %v1109_v44 }
 0x252   : > { %v712_v45 = vpop.permute.xlu1 %711  ;;  %745 = vmatprep.subr.mxu0 %v714_v48 }
 0x253   : > { %v715_v47 = vsel %vm396_vm7, %v710_v43, %v712_v45 }
 0x254   : > { %1059 = vmatpush3.msra.mxu1 %v715_v47 }
 0x255   : > { %1061 = vmatmul.mubr.msk.f32.vlgmr.msra.gmra.mrb[2].mxu1 %vm411_vm8, %v719_v23  ;;  %746 = vmatpush1.msra.mxu0 %v713_v49 }
 0x256   : > { %1026 = vmatmul.mubr.msk.f32.vlgmr.msra.gmra.mrb[2].mxu0 %vm411_vm8, %v719_v23 }
 0x25b   : > { %v724_v51 = vpop.permute.xlu0 %723 }
 0x328   : > { %v866_v6 = vpop.f32.mrb[2].mxu1 }
 0x329   : > { %v1062_v50 = vpop.f32.mrb[3].mxu1  ;;  %v795_v52 = vpop.f32.mrb[2].mxu0  ;;  %v867_v56 = vadd.f32 %v866_v6, %v724_v51 }
 0x32a   : > { %v796_v53 = vadd.f32 %v795_v52, %v724_v51  ;;  %v797_v54 = vpop.f32.mrb[3].mxu0 }
 0x32b   : > { %v798_v55 = vadd.f32 %v797_v54, %v724_v51 }
 0x32c   : > { %873 = vrot.lane.b32.xlu1 %v796_v53, %s1452_s19 }
 0x32d   : > { %875 = vrot.lane.b32.xlu0 %v798_v55, %s1452_s19 }
 0x330   : > { %877 = vrot.lane.b32.xlu1 %v867_v56, %s1452_s19 }
 0x39e   : > { %v874_v57 = vpop.permute.xlu1 %873 }
 0x39f   : > { %v886_v58 = vadd.f32 %v874_v57, %v1606_v2  ;;  %v876_v59 = vpop.permute.xlu0 %875 }
 0x3a0   : > { %v880_v60 = vsel %vm879_vm10, %v874_v57, %v876_v59 }
 0x3a1   : > { %v894_v61 = vmul.f32 0.70710677, %v886_v58  ;;  %v887_v62 = vadd.f32 %v880_v60, %v1602_v0  ;;  %v890_v2 = vmul.f32 0.5, %v886_v58 }
 0x3a2   : > { %v878_v63 = vpop.permute.xlu1 %877 }
 0x3a3   : > { %1333 = verf.f32 %v894_v61  ;;  %v895_v3 = vmul.f32 0.70710677, %v887_v62  ;;  %v881_v5 = vsel %vm879_vm10, %v876_v59, %v878_v63  ;;  %v889_v8 = vadd.f32 %v878_v63, %v1610_v4 }
 0x3a4   : > { %v888_v7 = vadd.f32 %v881_v5, %v1604_v1  ;;  %v891_v14 = vmul.f32 0.5, %v887_v62 }
 0x3a5   : > { %1335 = verf.f32 %v895_v3  ;;  %v897_v10 = vmul.f32 0.70710677, %v889_v8  ;;  %v893_v19 = vmul.f32 0.5, %v889_v8 }
 0x3a6   : > { %v896_v9 = vmul.f32 0.70710677, %v888_v7  ;;  %v892_v4 = vmul.f32 0.5, %v888_v7 }
 0x3a8   : > { %1337 = verf.f32 %v896_v9 }
 0x3a9   : > { %1339 = verf.f32 %v897_v10 }
 0x3ad   : > { %v1334_v11 = vpop.eup %1333 }
 0x3ae   : > { %v902_v12 = vadd.f32 1.0, %v1334_v11 }
 0x3af   : > { %v1336_v13 = vpop.eup %1335 }
 0x3b0   : > { %v906_v0 = vmul.f32 %v902_v12, %v890_v2  ;;  %v903_v15 = vadd.f32 1.0, %v1336_v13 }
 0x3b2   : > { %v1338_v16 = vpop.eup %1337  ;;  %914 = vrot.lane.b32.xlu0 %v906_v0, %s1449_s11  ;;  %v907_v1 = vmul.f32 %v903_v15, %v891_v14 }
 0x3b3   : > { %v1340_v17 = vpop.eup %1339  ;;  %v904_v18 = vadd.f32 1.0, %v1338_v16 }
 0x3b4   : > { %916 = vrot.lane.b32.xlu1 %v907_v1, %s1449_s11  ;;  %v905_v20 = vadd.f32 1.0, %v1340_v17 }
 0x3b5   : > { %v908_v21 = vmul.f32 %v904_v18, %v892_v4 }
 0x3b6   : > { %v909_v22 = vmul.f32 %v905_v20, %v893_v19 }
 0x3b7   : > { %918 = vrot.lane.b32.xlu0 %v908_v21, %s1449_s11 }
 0x3b8   : > { %920 = vrot.lane.b32.xlu1 %v909_v22, %s1449_s11  ;;  %s1371_s11 = scalar_lea.vmem %s1773_s15, 384 }
 0x3b9   : > { %p1372_p6 = scmp.ne.s32.totalorder %s1773_s15, %s1371_s11  ;;  %p1379_p10 = scmp.lt.s32.totalorder %s1377_s20, %s1371_s11 }
 0x3bb   : > { %p1373_p12 = pnand %p1372_p6, %p1831_p11  ;;  %p1380_p2 = por %p1379_p10, %p1378_p7 }
 0x3bd   : > { %p1374_p13 = pneg %p1373_p12 }
 0x3bf   : > { %p1381_p4 = pnand %p1380_p2, %p1374_p13 }
 0x424   : > { %v915_v24 = vpop.permute.xlu0 %914 }
 0x426   : > { %v917_v25 = vpop.permute.xlu1 %916 }
 0x427   : > { %v922_v26 = vsel %vm396_vm7, %v915_v24, %v917_v25 }
 0x428   : > { %928 = vst [vmem:[%s267_s14] sm:$0xff] %v922_v26 }
 0x429   : > { %v919_v27 = vpop.permute.xlu0 %918 }
 0x42a   : > { %v923_v28 = vsel %vm396_vm7, %v917_v25, %v919_v27  ;;  %v921_v29 = vpop.permute.xlu1 %920 }
 0x42b   : > { %929 = vst [vmem:[%s267_s14 + $0x8] sm:$0xff] %v923_v28  ;;  %v924_v31 = vsel %vm396_vm7, %v919_v27, %v921_v29 }
 0x42c   : > { %930 = vst [vmem:[%s267_s14 + $0x10] sm:$0xff] %v924_v31 }
 0x42d   : > { %1384 = shalt.err (!%p1381_p4)
}
 0x42e   : > { %s1385_s26 = scalar_lea.hbm %s1771_s29, 384  ;;  %s1389_s19 = scalar_lea.hbm %s1822_s6, 768 }
 0x42f   : > { %p1386_p5 = scmp.ne.s32.totalorder %s1771_s29, %s1385_s26  ;;  %p1390_p0 = scmp.lt.u32.totalorder %s1771_s29, %s1822_s6 }
 0x430   : > { %p1391_p1 = scmp.lt.u32.totalorder %s1389_s19, %s1385_s26  ;;  %p1393_p6 = scmp.lt.u32.totalorder %s1385_s26, %s1771_s29 }
 0x431   : > { %p1387_p8 = pnand %p1386_p5, %p1831_p11 }
 0x432   : > { %p1392_p3 = por %p1391_p1, %p1390_p0 }
 0x433   : > { %p1388_p9 = pneg %p1387_p8 }
 0x434   : > { %p1394_p12 = por %p1393_p6, %p1392_p3 }
 0x436   : > { %p1395_p13 = pnand %p1394_p12, %p1388_p9 }
 0x438   : > { %1398 = shalt.err (!%p1395_p13)
}
 0x439   : > { %1127 = dma.vmem_to_hbm [thread:$0]  (%p1831_p11), %s1773_s15, 384, %s1771_s29, %s932_s25  }
 0x43a PF: > { %s958_s14 = sand.u32 1, %s1425_s21   ;;  %p1832_p7 = scmp.ne.s32.totalorder %s1827_s10, 0 }
 0x43b   : > { %p1833_p10 = scmp.ge.s32.totalorder %s1437_s24, 2  ;;  %s959_s17 = scalar_lea.sflag [#allocation4], %s958_s14 }
 0x43d   : > { %p1134_p2 = pnand %p1833_p10, %p1832_p7 }
 0x43f   : > { %1420 = dma.done.wait (!%p1134_p2), %s959_s17, 384  }
 0x440   : > { %1422 = vsyncadd (!%p1134_p2), %s959_s17, 4294966912  ;;  %p19_p4 = scmp.ge.s32.totalorder %s1514_s27, 4   ;;  %s1834_s21 = smov %s1429_s22 }
 0x441   : > { %s1835_s22 = smov %s1433_s23  ;;  %s1836_s23 = smov %s1526_s30 }
 0x442   : > { %s1837_s24 = smov %s1514_s27  ;;  %21 = sbr.rel (!%p19_p4) target bundleno = 5 (0x5), region = 89 }
 0x449   :  { %964 = vsyncpa [#allocation3], 1 }
 0x44a   :  { %966 = vsyncpa [#allocation3 + $0x1], 1 }
 0x44b   :  { %967 = vsyncpa [#allocation4], 1 }
 0x44c   :  { %969 = vsyncpa [#allocation4 + $0x1], 1 }

</bundles_post_ra>
